<compile_context>
chip_gen: v6e
topology: v6e:2x2x1
jax: 0.10.0
libtpu: 0.0.40
codegen_flags: <defaults>
</compile_context>

<pallas_src>
import math
import numpy as np
import jax
import jax.numpy as jnp
from jax.experimental import pallas as pl
from jax.experimental.pallas import tpu as pltpu


# ----------------------------- operator builders -----------------------------

def _adaptive_avg_pool_matrix(in_len: int, out_len: int) -> np.ndarray:
    """P[i, r] s.t. pooled[i] = sum_r P[i, r] * x[r]  (PyTorch AdaptiveAvgPool semantics)."""
    P = np.zeros((out_len, in_len), dtype=np.float32)
    for i in range(out_len):
        start = (i * in_len) // out_len
        end = -(-((i + 1) * in_len) // out_len)  # ceil
        P[i, start:end] = 1.0 / float(end - start)
    return P


def _bilinear_upsample_matrix(out_len: int, in_len: int) -> np.ndarray:
    """U[h, i] s.t. up[h] = sum_i U[h, i] * y[i]  (bilinear, align_corners=True).

    pytorchcv's InterpolationBlock defaults to align_corners=True, which is what
    PoolingBranch uses.
    """
    U = np.zeros((out_len, in_len), dtype=np.float32)
    if in_len == 1:
        U[:, 0] = 1.0
        return U
    for h in range(out_len):
        src = h * (in_len - 1) / (out_len - 1) if out_len > 1 else 0.0
        i0 = min(int(np.floor(src)), in_len - 1)
        i1 = min(i0 + 1, in_len - 1)
        frac = src - i0
        U[h, i0] += 1.0 - frac
        U[h, i1] += frac
    return U


def _pick_row_tile(total_rows: int, width: int, bytes_per_row: int, budget: int) -> int:
    """Largest row tile t such that t divides total_rows, (t*width) % 128 == 0 (so the
    flattened block stays lane-aligned) and t*bytes_per_row <= budget.  Falls back to
    the full extent (always a legal block shape) when nothing fits."""
    if total_rows * bytes_per_row <= budget:
        return total_rows
    g = 128 // math.gcd(width, 128)          # row granularity keeping t*width % 128 == 0
    t = (budget // max(1, bytes_per_row) // g) * g
    t = min(t, (total_rows // g) * g)
    while t >= g:
        if total_rows % t == 0:
            return t
        t -= g
    return total_rows  # no aligned divisor fits the budget; take everything (legal)


# ----------------------- kernel 1: pool + 1x1 conv + BN + ReLU -----------------------

def _pool_conv_bn_relu_kernel(x_ref, pk_ref, w_ref, b_ref, y_ref, acc_ref):
    # x_ref:   (C_in, tHW)    flattened input-row tile (batch squeezed), io dtype
    # pk_ref:  (tHW, dd)      Kronecker adaptive-avg-pool rows for this tile, io dtype
    # w_ref:   (C_out, C_in)  1x1 conv weight with BN scale folded in, f32
    # b_ref:   (C_out, 1)     BN folded bias, f32
    # y_ref:   (C_out, dd)    pooled branch activations (batch squeezed), f32
    # acc_ref: (C_in, dd)     f32 accumulator over the spatial reduction-tile axis
    k = pl.program_id(1)

    @pl.when(k == 0)
    def _init():
        acc_ref[...] = jnp.zeros_like(acc_ref)

    # Pool (both H and W at once): huge spatial dim on K, tiny d*d on N.
    acc_ref[...] += jnp.dot(x_ref[...], pk_ref[...],
                            preferred_element_type=jnp.float32)

    @pl.when(k == pl.num_programs(1) - 1)
    def _finalize():
        y = jnp.dot(w_ref[...], acc_ref[...], preferred_element_type=jnp.float32)
        y_ref[...] = jnp.maximum(y + b_ref[...], 0.0).astype(y_ref.dtype)


# ----------------------------- kernel 2: bilinear upsample -----------------------------

def _upsample_kernel(y_ref, uk_ref, o_ref):
    # y_ref:  (C_out, dd)       pooled branch activations (batch squeezed), f32
    # uk_ref: (dd, tHo*Wo)      Kronecker bilinear upsample block, io dtype
    # o_ref:  (C_out, tHo*Wo)   lane-dense output tile (batch squeezed), io dtype
    lhs = y_ref[...].astype(uk_ref.dtype)
    o = jnp.dot(lhs, uk_ref[...], preferred_element_type=jnp.float32)
    o_ref[...] = o.astype(o_ref.dtype)


# ----------------------------- wrapper -----------------------------

def pooling_branch(x, conv_w, bn_gamma, bn_beta, bn_mean, bn_var,
                   in_size, down_size, eps=1e-5):
    N, C_in, H, W = x.shape
    C_out = conv_w.shape[0]
    d = int(down_size)
    dd = d * d
    Ho, Wo = in_size
    io_dtype = x.dtype          # bf16-ready: x, pool/upsample matrices and out stay here
    io_itemsize = jnp.dtype(io_dtype).itemsize

    # Kronecker adaptive-avg-pool:  pk[h*W + w, i*d + j] = P_h[i, h] * P_w[j, w]
    P_h = _adaptive_avg_pool_matrix(H, d)          # (d, H)
    P_w = _adaptive_avg_pool_matrix(W, d)          # (d, W)
    pk = jnp.asarray(np.einsum('ih,jw->hwij', P_h, P_w).reshape(H * W, dd),
                     dtype=io_dtype)

    # Kronecker bilinear upsample:  uk[i*d + j, r*Wo + w] = U_h[r, i] * U_w[w, j]
    U_h = _bilinear_upsample_matrix(Ho, d)         # (Ho, d)
    U_w = _bilinear_upsample_matrix(Wo, d)         # (Wo, d)
    uk = jnp.asarray(np.einsum('ri,wj->ijrw', U_h, U_w).reshape(dd, Ho * Wo),
                     dtype=io_dtype)

    # Fold BatchNorm (eval mode) into the 1x1 conv weight + a bias.
    scale = (bn_gamma / jnp.sqrt(bn_var + eps)).astype(jnp.float32)
    wc = conv_w.reshape(C_out, C_in).astype(jnp.float32) * scale[:, None]
    bias = (bn_beta.astype(jnp.float32)
            - bn_mean.astype(jnp.float32) * scale).reshape(C_out, 1)

    # Generation-aware tile budget / VMEM limit (v5e/v6e: 128 MiB, v7x: 64 MiB per core).
    try:
        vmem_cap = int(pltpu.get_tpu_info().vmem_capacity_bytes)
    except Exception:  # pragma: no cover - conservative fallback
        vmem_cap = 64 * 1024 * 1024
    budget = max(2 << 20, vmem_cap // 8)                 # ~16 MiB v5e/v6e, ~8 MiB v7x
    vmem_limit = min((vmem_cap * 3) // 4, 100 * 1024 * 1024)

    # ---- kernel 1 tiling: H is a reduction axis, flattened blocks stay lane-aligned ----
    k1_bytes_per_row = W * io_itemsize * (C_in + dd)     # x tile + pk tile per input row
    tH = _pick_row_tile(H, W, k1_bytes_per_row, budget)
    tHW = tH * W
    nK = H // tH

    x_flat = x.reshape(N, C_in, H * W)                   # contiguous reshape: free

    y = pl.pallas_call(
        _pool_conv_bn_relu_kernel,
        out_shape=jax.ShapeDtypeStruct((N, C_out, dd), jnp.float32),
        grid=(N, nK),
        in_specs=[
            pl.BlockSpec((pl.Squeezed(), C_in, tHW), lambda n, k: (n, 0, k)),
            pl.BlockSpec((tHW, dd), lambda n, k: (k, 0)),
            pl.BlockSpec((C_out, C_in), lambda n, k: (0, 0)),
            pl.BlockSpec((C_out, 1), lambda n, k: (0, 0)),
        ],
        out_specs=pl.BlockSpec((pl.Squeezed(), C_out, dd), lambda n, k: (n, 0, 0)),
        scratch_shapes=[pltpu.VMEM((C_in, dd), jnp.float32)],
        compiler_params=pltpu.CompilerParams(
            dimension_semantics=("parallel", "arbitrary"),
            vmem_limit_bytes=vmem_limit),
        cost_estimate=pl.CostEstimate(
            flops=int(2 * N * (C_in * H * W * dd + C_out * C_in * dd)),
            transcendentals=0,
            bytes_accessed=int(N * C_in * H * W * io_itemsize
                               + N * H * W * dd * io_itemsize
                               + N * C_out * dd * 4)),
    )(x_flat, pk, wc, bias)

    # ---- kernel 2 tiling: lane-dense output rows; keep >=2 row steps when N == 1 ----
    k2_bytes_per_row = Wo * io_itemsize * (C_out + dd)   # out tile + uk tile per output row
    budget2 = budget
    if N == 1 and Ho >= 2:
        # give the second TensorCore (v7x) work via the parallel row axis
        budget2 = min(budget2, (Ho // 2) * k2_bytes_per_row)
    tHo = _pick_row_tile(Ho, Wo, k2_bytes_per_row, budget2)
    tRW = tHo * Wo
    nR = Ho // tHo

    out_flat = pl.pallas_call(
        _upsample_kernel,
        out_shape=jax.ShapeDtypeStruct((N, C_out, Ho * Wo), io_dtype),
        grid=(N, nR),
        in_specs=[
            pl.BlockSpec((pl.Squeezed(), C_out, dd), lambda n, r: (n, 0, 0)),
            pl.BlockSpec((dd, tRW), lambda n, r: (0, r)),
        ],
        out_specs=pl.BlockSpec((pl.Squeezed(), C_out, tRW), lambda n, r: (n, 0, r)),
        compiler_params=pltpu.CompilerParams(
            dimension_semantics=("parallel", "parallel"),
            vmem_limit_bytes=vmem_limit),
        cost_estimate=pl.CostEstimate(
            flops=int(2 * N * C_out * dd * Ho * Wo),
            transcendentals=0,
            bytes_accessed=int(N * C_out * dd * 4
                               + N * dd * Ho * Wo * io_itemsize
                               + N * C_out * Ho * Wo * io_itemsize)),
    )(y, uk)

    return out_flat.reshape(N, C_out, Ho, Wo)


# ----------------------------- pure-JAX reference -----------------------------

def _reference(x, conv_w, bn_gamma, bn_beta, bn_mean, bn_var, in_size, down_size, eps=1e-5):
    N, C_in, H, W = x.shape
    C_out = conv_w.shape[0]
    d = int(down_size)
    Ho, Wo = in_size
    P_h = _adaptive_avg_pool_matrix(H, d)
    P_w = _adaptive_avg_pool_matrix(W, d)
    U_h = _bilinear_upsample_matrix(Ho, d)
    U_w = _bilinear_upsample_matrix(Wo, d)
    xf = x.astype(jnp.float32)
    pooled = jnp.einsum('ih,nchw,jw->ncij', P_h, xf, P_w)
    w2 = conv_w.reshape(C_out, C_in).astype(jnp.float32)
    scale = bn_gamma / jnp.sqrt(bn_var + eps)
    y = jnp.einsum('oc,ncij->noij', w2, pooled)
    y = y * scale[None, :, None, None] + (bn_beta - bn_mean * scale)[None, :, None, None]
    y = jnp.maximum(y, 0.0)
    return jnp.einsum('ri,noij,wj->norw', U_h, y, U_w)


# ----------------------------- demo -----------------------------

if __name__ == "__main__":
    batch, in_channels, out_channels = 2, 4, 8
    H = W = 16
    in_size = (H, W)
    down_size = 4

    key = jax.random.PRNGKey(0)
    k_x, k_w, k_g, k_b, k_m, k_v = jax.random.split(key, 6)

    x = jax.random.normal(k_x, (batch, in_channels, H, W), dtype=jnp.float32)
    conv_w = 0.1 * jax.random.normal(k_w, (out_channels, in_channels, 1, 1), dtype=jnp.float32)
    bn_gamma = 1.0 + 0.1 * jax.random.normal(k_g, (out_channels,), dtype=jnp.float32)
    bn_beta = 0.1 * jax.random.normal(k_b, (out_channels,), dtype=jnp.float32)
    bn_mean = 0.1 * jax.random.normal(k_m, (out_channels,), dtype=jnp.float32)
    bn_var = jax.random.uniform(k_v, (out_channels,), dtype=jnp.float32,
                                minval=0.5, maxval=1.5)

    out = pooling_branch(x, conv_w, bn_gamma, bn_beta, bn_mean, bn_var,
                         in_size=in_size, down_size=down_size)
    out = jax.block_until_ready(out)

    assert out.shape == (batch, out_channels, H, W), out.shape
    assert out.dtype == x.dtype

    ref = _reference(x, conv_w, bn_gamma, bn_beta, bn_mean, bn_var, in_size, down_size)
    max_err = float(jnp.max(jnp.abs(out.astype(jnp.float32) - ref)))
    assert jnp.allclose(out.astype(jnp.float32), ref, rtol=5e-2, atol=5e-3), max_err

    print("KERNEL_OK")
</pallas_src>

<mosaic_0001>
module attributes {stable_mosaic.version = 11 : i64} {
  func.func @_pool_conv_bn_relu_kernel(%arg0: i32, %arg1: i32, %arg2: memref<1x4x256xf32, #tpu.memory_space<vmem>>, %arg3: memref<256x16xf32, #tpu.memory_space<vmem>>, %arg4: memref<8x4xf32, #tpu.memory_space<vmem>>, %arg5: memref<8x1xf32, #tpu.memory_space<vmem>>, %arg6: memref<1x8x16xf32, #tpu.memory_space<vmem>>, %arg7: memref<4x16xf32, #tpu.memory_space<vmem>>) attributes {dimension_semantics = [#tpu.dimension_semantics<parallel>, #tpu.dimension_semantics<arbitrary>], iteration_bounds = array<i64: 2, 1>, scalar_prefetch = 0 : i64, scratch_operands = 1 : i64, tpu.core_type = #tpu.core_type<tc>, window_params = [{transform_indices = @transform_0, window_bounds = array<i64: 1, 4, 256>}, {transform_indices = @transform_1, window_bounds = array<i64: 256, 16>}, {pipeline_mode = #tpu.pipeline_mode<synchronous>, transform_indices = @transform_2, window_bounds = array<i64: 8, 4>}, {pipeline_mode = #tpu.pipeline_mode<synchronous>, transform_indices = @transform_3, window_bounds = array<i64: 8, 1>}, {transform_indices = @transform_4, window_bounds = array<i64: 1, 8, 16>}]} {
    %c0_i32 = arith.constant 0 : i32
    %0 = arith.cmpi eq, %arg1, %c0_i32 : i32
    %1 = arith.extui %0 : i1 to i32
    %c0_i32_0 = arith.constant 0 : i32
    %2 = arith.cmpi ne, %1, %c0_i32_0 : i32
    scf.if %2 {
      %cst_11 = arith.constant 0.000000e+00 : f32
      %13 = vector.broadcast %cst_11 : f32 to vector<4x16xf32>
      %c0_12 = arith.constant 0 : index
      %c0_13 = arith.constant 0 : index
      %14 = vector.load %arg7[%c0_12, %c0_13] : memref<4x16xf32, #tpu.memory_space<vmem>>, vector<4x16xf32>
      tpu.vector_store %arg7[%c0_12, %c0_13], %13 {strides = array<i32>} : memref<4x16xf32, #tpu.memory_space<vmem>>, vector<4x16xf32>,
    } else {
    }
    %c0 = arith.constant 0 : index
    %c0_1 = arith.constant 0 : index
    %3 = vector.load %arg7[%c0, %c0_1] : memref<4x16xf32, #tpu.memory_space<vmem>>, vector<4x16xf32>
    %c0_2 = arith.constant 0 : index
    %c0_3 = arith.constant 0 : index
    %c0_4 = arith.constant 0 : index
    %4 = vector.load %arg2[%c0_2, %c0_3, %c0_4] : memref<1x4x256xf32, #tpu.memory_space<vmem>>, vector<1x4x256xf32>
    %5 = vector.shape_cast %4 : vector<1x4x256xf32> to vector<4x256xf32>
    %c0_5 = arith.constant 0 : index
    %c0_6 = arith.constant 0 : index
    %6 = vector.load %arg3[%c0_5, %c0_6] : memref<256x16xf32, #tpu.memory_space<vmem>>, vector<256x16xf32>
    %cst = arith.constant dense<0.000000e+00> : vector<4x16xf32>
    %7 = tpu.matmul %5, %6, %cst {dimension_numbers = #tpu.dot_dimension_numbers<[1], [0], [0], [1], [0, 0, 1, 1], [], []>} : vector<4x256xf32>, vector<256x16xf32>, vector<4x16xf32> -> vector<4x16xf32>
    %8 = arith.addf %3, %7 : vector<4x16xf32>
    %c0_7 = arith.constant 0 : index
    %c0_8 = arith.constant 0 : index
    %9 = vector.load %arg7[%c0_7, %c0_8] : memref<4x16xf32, #tpu.memory_space<vmem>>, vector<4x16xf32>
    tpu.vector_store %arg7[%c0_7, %c0_8], %8 {strides = array<i32>} : memref<4x16xf32, #tpu.memory_space<vmem>>, vector<4x16xf32>,
    %c0_i32_9 = arith.constant 0 : i32
    %10 = arith.cmpi eq, %arg1, %c0_i32_9 : i32
    %11 = arith.extui %10 : i1 to i32
    %c0_i32_10 = arith.constant 0 : i32
    %12 = arith.cmpi ne, %11, %c0_i32_10 : i32
    scf.if %12 {
      %c0_11 = arith.constant 0 : index
      %c0_12 = arith.constant 0 : index
      %13 = vector.load %arg4[%c0_11, %c0_12] : memref<8x4xf32, #tpu.memory_space<vmem>>, vector<8x4xf32>
      %c0_13 = arith.constant 0 : index
      %c0_14 = arith.constant 0 : index
      %14 = vector.load %arg7[%c0_13, %c0_14] : memref<4x16xf32, #tpu.memory_space<vmem>>, vector<4x16xf32>
      %cst_15 = arith.constant dense<0.000000e+00> : vector<8x16xf32>
      %15 = tpu.matmul %13, %14, %cst_15 {dimension_numbers = #tpu.dot_dimension_numbers<[1], [0], [0], [1], [0, 0, 1, 1], [], []>} : vector<8x4xf32>, vector<4x16xf32>, vector<8x16xf32> -> vector<8x16xf32>
      %c0_16 = arith.constant 0 : index
      %c0_17 = arith.constant 0 : index
      %16 = vector.load %arg5[%c0_16, %c0_17] : memref<8x1xf32, #tpu.memory_space<vmem>>, vector<8x1xf32>
      %17 = vector.broadcast %16 : vector<8x1xf32> to vector<8x16xf32>
      %18 = arith.addf %15, %17 : vector<8x16xf32>
      %cst_18 = arith.constant 0.000000e+00 : f32
      %19 = vector.broadcast %cst_18 : f32 to vector<8x16xf32>
      %20 = arith.maximumf %18, %19 : vector<8x16xf32>
      %c0_19 = arith.constant 0 : index
      %c0_20 = arith.constant 0 : index
      %c0_21 = arith.constant 0 : index
      %21 = vector.load %arg6[%c0_19, %c0_20, %c0_21] : memref<1x8x16xf32, #tpu.memory_space<vmem>>, vector<1x8x16xf32>
      %22 = vector.shape_cast %21 : vector<1x8x16xf32> to vector<8x16xf32>
      %23 = vector.shape_cast %20 : vector<8x16xf32> to vector<1x8x16xf32>
      tpu.vector_store %arg6[%c0_19, %c0_20, %c0_21], %23 {strides = array<i32>} : memref<1x8x16xf32, #tpu.memory_space<vmem>>, vector<1x8x16xf32>,
    } else {
    }
    return
  }
  func.func @transform_0(%arg0: i32, %arg1: i32) -> (i32, i32, i32) {
    %c0_i32 = arith.constant 0 : i32
    %c0_i32_0 = arith.constant 0 : i32
    return %arg0, %c0_i32, %arg1 : i32, i32, i32
  }
  func.func @transform_1(%arg0: i32, %arg1: i32) -> (i32, i32) {
    %c0_i32 = arith.constant 0 : i32
    %c0_i32_0 = arith.constant 0 : i32
    return %arg1, %c0_i32 : i32, i32
  }
  func.func @transform_2(%arg0: i32, %arg1: i32) -> (i32, i32) {
    %c0_i32 = arith.constant 0 : i32
    %c0_i32_0 = arith.constant 0 : i32
    %c0_i32_1 = arith.constant 0 : i32
    return %c0_i32, %c0_i32_0 : i32, i32
  }
  func.func @transform_3(%arg0: i32, %arg1: i32) -> (i32, i32) {
    %c0_i32 = arith.constant 0 : i32
    %c0_i32_0 = arith.constant 0 : i32
    %c0_i32_1 = arith.constant 0 : i32
    return %c0_i32, %c0_i32_0 : i32, i32
  }
  func.func @transform_4(%arg0: i32, %arg1: i32) -> (i32, i32, i32) {
    %c0_i32 = arith.constant 0 : i32
    %c0_i32_0 = arith.constant 0 : i32
    %c0_i32_1 = arith.constant 0 : i32
    return %arg0, %c0_i32, %c0_i32_0 : i32, i32, i32
  }
}

</mosaic_0001>

<bundles_post_ra>
// kernel: tpu_custom_call.1
= control target key start
LH: loop header
LB: loop body
LE: loop exit
PB: predicated region body
PF: predicated region fallthrough
CT: control target
= control target key end

     0   :  { %9 = vsyncpa [#allocation4], 0  ;;  %s982_s0 = inlined_call_operand.vmem [shape: f32[2,4,256], index: 0, kind: input, shape index: {}]   ;;  %s983_s1 = inlined_call_operand.vmem [shape: f32[256,16], index: 1, kind: input, shape index: {}]   ;;  %s984_s2 = inlined_call_operand.vmem [shape: f32[8,4], index: 2, kind: input, shape index: {}]   ;;  %s985_s3 = inlined_call_operand.vmem [shape: f32[8,1], index: 3, kind: input, shape index: {}]   ;;  %s986_s4 = inlined_call_operand.hbm [shape: f32[2,8,16], index: 4, kind: output, shape index: {}]  }
   0x1   :  { %11 = vsyncpa [#allocation4 + $0x1], 0  ;;  %s781_s15 = smov 0   ;;  %s783_s16 = smov 0  }
   0x2   :  { %s785_s17 = smov 0   ;;  %s787_s18 = smov 0  }
   0x3   :  { %s789_s19 = smov 0   ;;  %s791_s20 = smov 0  }
   0x4 LB: > { %s556_s21 = sadd.s32 4294967295, %s750_s20   ;;  %s557_s22 = sadd.s32 4294967294, %s750_s20   ;;  %s750_s20 = sphi %s791_s20, %s17_s20   ;;  %s746_s19 = sphi %s789_s19, %s993_s19   ;;  %s742_s18 = sphi %s787_s18, %s992_s18   ;;  %s738_s17 = sphi %s785_s17, %s991_s17   ;;  %s734_s16 = sphi %s783_s16, %s990_s16   ;;  %s730_s15 = sphi %s781_s15, %s989_s15  }
   0x5   : > { %s29_s23 = sadd.s32 1, %s746_s19  ;;  %s132_s24 = sadd.s32 1, %s738_s17 }
   0x6   : > { %p31_p0 = scmp.ge.s32.totalorder %s29_s23, 2  ;;  %p142_p1 = scmp.ne.s32.totalorder %s738_s17, %s734_s16 }
   0x7   : > { %p143_p2 = scmp.eq.s32.totalorder %s556_s21, 1  ;;  %p148_p3 = scmp.ne.s32.totalorder %s734_s16, %s730_s15 }
   0x8   : > { %s995_s23 = smov (%p31_p0, %s29_s23), 0  ;;  %p149_p5 = scmp.eq.s32.totalorder %s557_s22, 1 }
   0x9   : > { %p821_p4 = por %p143_p2, %p142_p1  ;;  %s129_s26 = ssub.s32 %s746_s19, %s995_s23 }
   0xa   : > { %p561_p6 = scmp.ge.s32.totalorder %s750_s20, 1  ;;  %p130_p7 = scmp.eq.s32.totalorder %s129_s26, 0 }
   0xb   : > { %p828_p8 = por %p149_p5, %p148_p3  ;;  %p195_p9 = scmp.lt.s32.totalorder %s750_s20, 3 }
   0xc   : > { %s834_s28 = scalar_select %p130_p7, %s738_s17, %s132_s24  }
   0xd   : > { %p196_p10 = pnand %p561_p6, %p195_p9 }
   0xe   : > { %p231_p11 = scmp.lt.s32.totalorder (!%p196_p10), %s742_s18, 1  ;;  %s227_s12 = sand.u32 (!%p196_p10), 1, %s734_s16  }
   0xf   : > { %199 = sbr.rel (%p196_p10) target bundleno = 471 (0x1d7), region = 36  ;;  %s568_s14 = sshll.u32 (!%p196_p10), %s742_s18, 7 }
  0x10   : > { %s466_s30 = scalar_lea.hbm (!%p196_p10), %s986_s4, %s568_s14  ;;  %s755_s6 = smov (!%p196_p10), [#allocation3]  }
  0x14   : > { %v285_v0 = vld [vmem:[%s983_s1 + $0xf8] sm:$0xff]  ;;  %v284_v2 = vld [vmem:[%s983_s1 + $0xf0] sm:$0xff]  ;;  %v283_v4 = vld [vmem:[%s983_s1 + $0xe8] sm:$0xff]  ;;  %s232_s13 = scalar_select %p231_p11, %s742_s18, 1  ;;  %vm250_vm0 = vcmask 125952   ;;  %v752_v34 = vmov 0.0  }
  0x15   : > { %v269_v1 = vld [vmem:[%s983_s1 + $0x78] sm:$0xff]  ;;  %572 = vmatprep.subr.mxu0 %v285_v0  ;;  %v268_v3 = vld [vmem:[%s983_s1 + $0x70] sm:$0xff]  ;;  %v267_v5 = vld [vmem:[%s983_s1 + $0x68] sm:$0xff]  ;;  %251 = vst.msk [vmem:[#allocation2] sm:$0xf] %vm250_vm0, %v752_v34  ;;  %609 = vmatprep.subr.mxu1 %v752_v34  ;;  %vm753_vm1 = vmmov 0  }
  0x16   : > { %573 = vmatpush3.msra.mxu0 %v269_v1  ;;  %v282_v6 = vld [vmem:[%s983_s1 + $0xe0] sm:$0xff]  ;;  %s571_s26 = sshll.u32 %s232_s13, 3  ;;  %v281_v8 = vld [vmem:[%s983_s1 + $0xd8] sm:$0xff]  ;;  %v280_v10 = vld [vmem:[%s983_s1 + $0xd0] sm:$0xff]  ;;  %611 = vmatprep.mubr.msk.f32.mxu1 %vm753_vm1, %v752_v34  ;;  %v754_v36 = vmov 0   ;;  %vm377_vm2 = vcmask 1043456  }
  0x17   : > { %574 = vmatprep.subr.mxu0 %v284_v2  ;;  %v266_v7 = vld [vmem:[%s983_s1 + $0x60] sm:$0xff]  ;;  %v265_v9 = vld [vmem:[%s983_s1 + $0x58] sm:$0xff]  ;;  %s238_s11 = scalar_lea.vmem %s982_s0, %s571_s26  ;;  %v264_v11 = vld [vmem:[%s983_s1 + $0x50] sm:$0xff]  ;;  %672 = vset.pattern.permute.xlu0 %v754_v36  ;;  %vm373_vm3 = vcmask 31744   ;;  %s562_s13 = sshll.u32 %s227_s12, 3  ;;  %vm452_vm4 = vcmask 130048  }
  0x18   : > { %575 = vmatpush3.msra.mxu0 %v268_v3  ;;  %v279_v12 = vld [vmem:[%s983_s1 + $0xc8] sm:$0xff]  ;;  %v253_v13 = vld [vmem:[%s238_s11] sm:$0xff]  ;;  %v277_v18 = vld [vmem:[%s983_s1 + $0xb8] sm:$0xff]  ;;  %s229_s21 = scalar_lea.vmem [#allocation3], %s562_s13  ;;  %s455_s26 = scalar_lea.sflag [#allocation4], %s227_s12 }
  0x19   : > { %576 = vmatprep.subr.mxu0 %v283_v4  ;;  %v263_v14 = vld [vmem:[%s983_s1 + $0x48] sm:$0xff]  ;;  %v287_v15 = vcombine.high %v253_v13, %v253_v13  ;;  %v278_v16 = vld [vmem:[%s983_s1 + $0xc0] sm:$0xff]  ;;  %v261_v19 = vld [vmem:[%s983_s1 + $0x38] sm:$0xff]  ;;  %s468_s22 = sshll.u32 %s229_s21, 4  ;;  %s678_s18 = sshll.u32 %s755_s6, 4  ;;  %s469_s22 = int_to_ptr.vmem [resolvable:$true] %s468_s22  ;;  %s679_s18 = int_to_ptr.vmem [resolvable:$false] %s678_s18 }
  0x1a   : > { %577 = vmatpush3.msra.mxu0 %v267_v5  ;;  %v262_v17 = vld [vmem:[%s983_s1 + $0x40] sm:$0xff]  ;;  %v276_v20 = vld [vmem:[%s983_s1 + $0xb0] sm:$0xff]  ;;  %v275_v22 = vld [vmem:[%s983_s1 + $0xa8] sm:$0xff]  ;;  %s674_s5 = scalar_lea.vmem %s469_s22, 128  ;;  %s680_s7 = scalar_lea.vmem %s679_s18, 256 }
  0x1b   : > { %578 = vmatprep.subr.mxu0 %v282_v6  ;;  %353 = vmatprep.mubr.f32.mxu0 %v287_v15  ;;  %v260_v21 = vld [vmem:[%s983_s1 + $0x30] sm:$0xff]  ;;  %v259_v23 = vld [vmem:[%s983_s1 + $0x28] sm:$0xff]  ;;  %v274_v24 = vld [vmem:[%s983_s1 + $0xa0] sm:$0xff]  ;;  %p675_p12 = scmp.ne.s32.totalorder %s469_s22, %s674_s5  ;;  %p681_p1 = scmp.lt.s32.totalorder %s469_s22, %s679_s18 }
  0x1c   : > { %579 = vmatpush3.msra.mxu0 %v266_v7  ;;  %v258_v25 = vld [vmem:[%s983_s1 + $0x20] sm:$0xff]  ;;  %v273_v26 = vld [vmem:[%s983_s1 + $0x98] sm:$0xff]  ;;  %v272_v28 = vld [vmem:[%s983_s1 + $0x90] sm:$0xff]  ;;  %p682_p2 = scmp.lt.s32.totalorder %s680_s7, %s674_s5 }
  0x1d   : > { %580 = vmatprep.subr.mxu0 %v281_v8  ;;  %v257_v27 = vld [vmem:[%s983_s1 + $0x18] sm:$0xff]  ;;  %v256_v29 = vld [vmem:[%s983_s1 + $0x10] sm:$0xff]  ;;  %v271_v30 = vld [vmem:[%s983_s1 + $0x88] sm:$0xff]  ;;  %p676_p13 = pnand %p675_p12, %p821_p4 }
  0x1e   : > { %581 = vmatpush3.msra.mxu0 %v265_v9  ;;  %v255_v31 = vld [vmem:[%s983_s1 + $0x8] sm:$0xff]  ;;  %v270_v32 = vld [vmem:[%s983_s1 + $0x80] sm:$0xff]  ;;  %p683_p3 = por %p682_p2, %p681_p1 }
  0x1f   : > { %582 = vmatprep.subr.mxu0 %v280_v10  ;;  %v254_v33 = vld [vmem:[%s983_s1] sm:$0xff]  ;;  %p677_p0 = pneg %p676_p13 }
  0x20   : > { %583 = vmatpush3.msra.mxu0 %v264_v11  ;;  %v367_v35 = vld [vmem:[%s985_s3] sm:$0xff] }
  0x21   : > { %584 = vmatprep.subr.mxu0 %v279_v12  ;;  %370 = vperm.xlu0 %672, %v367_v35   ;;  %v252_v39 = vld [vmem:[#allocation2] sm:$0xf]  ;;  %p684_p5 = pnand %p683_p3, %p677_p0 }
  0x22   : > { %585 = vmatpush3.msra.mxu0 %v263_v14  ;;  %v365_v42 = vld [vmem:[%s984_s2] sm:$0xff] }
  0x23   : > { %586 = vmatprep.subr.mxu0 %v278_v16 }
  0x24   : > { %587 = vmatpush3.msra.mxu0 %v262_v17 }
  0x25   : > { %588 = vmatprep.subr.mxu0 %v277_v18 }
  0x26   : > { %589 = vmatpush3.msra.mxu0 %v261_v19 }
  0x27   : > { %590 = vmatprep.subr.mxu0 %v276_v20 }
  0x28   : > { %591 = vmatpush3.msra.mxu0 %v260_v21 }
  0x29   : > { %592 = vmatprep.subr.mxu0 %v275_v22 }
  0x2a   : > { %593 = vmatpush3.msra.mxu0 %v259_v23 }
  0x2b   : > { %594 = vmatprep.subr.mxu0 %v274_v24 }
  0x2c   : > { %595 = vmatpush3.msra.mxu0 %v258_v25 }
  0x2d   : > { %596 = vmatprep.subr.mxu0 %v273_v26 }
  0x2e   : > { %597 = vmatpush3.msra.mxu0 %v257_v27 }
  0x2f   : > { %598 = vmatprep.subr.mxu0 %v272_v28 }
  0x30   : > { %599 = vmatpush3.msra.mxu0 %v256_v29 }
  0x31   : > { %600 = vmatprep.subr.mxu0 %v271_v30 }
  0x32   : > { %601 = vmatpush3.msra.mxu0 %v255_v31 }
  0x33   : > { %602 = vmatprep.subr.mxu0 %v270_v32 }
  0x34   : > { %603 = vmatpush3.msra.mxu0 %v254_v33 }
  0x35   : > { %354 = vmatmul.mubr.f32.vlgmr.msra.gmra.mxu0 %v253_v13 }
  0x9c   : > { %v371_v44 = vpop.permute.xlu0 %370 }
  0xf5   : > { %v604_v37 = vpop.f32.mrf.mxu0 }
  0xf7   : > { %v605_v38 = vpop.f32.mrf.mxu0 }
  0xf8   : > { %v606_v40 = vadd.f32 %v605_v38, %v604_v37 }
  0xfa   : > { %v359_v41 = vadd.f32 %v606_v40, %v252_v39 }
  0xfc   : > { %361 = vst.msk [vmem:[#allocation2] sm:$0xf] %vm250_vm0, %v359_v41 }
 0x103   : > { %v366_v43 = vld [vmem:[#allocation2] sm:$0xf] }
 0x104   : > { %610 = vmatpush3.msk.msra.mxu1 %vm377_vm2, %v366_v43 }
 0x105   : > { %612 = vmatmul.mubr.msk.f32.vlgmr.msra.gmra.mxu1 %vm373_vm3, %v365_v42 }
 0x1c5   : > { %v447_v45 = vpop.f32.mrf.mxu1 }
 0x1c6   : > { %v448_v46 = vadd.f32 %v447_v45, %v371_v44 }
 0x1c7   : > { %v613_v47 = vpop.f32.mrf.mxu1 }
 0x1c8   : > { %v451_v48 = vmax.f32 %v448_v46, 0.0 }
 0x1ca   : > { %453 = vst.msk [vmem:[%s229_s21] sm:$0xff] %vm452_vm4, %v451_v48 }
 0x1cb   : > { %687 = shalt.err (!%p684_p5)
}
 0x1cc   : > { %s688_s8 = scalar_lea.hbm %s466_s30, 128  ;;  %s692_s11 = scalar_lea.hbm %s986_s4, 256 }
 0x1cd   : > { %p689_p6 = scmp.ne.s32.totalorder %s466_s30, %s688_s8  ;;  %p693_p10 = scmp.lt.s32.totalorder %s466_s30, %s986_s4 }
 0x1ce   : > { %p694_p11 = scmp.lt.s32.totalorder %s692_s11, %s688_s8 }
 0x1cf   : > { %p690_p7 = pnand %p689_p6, %p821_p4 }
 0x1d0   : > { %p695_p12 = por %p694_p11, %p693_p10 }
 0x1d1   : > { %p691_p9 = pneg %p690_p7 }
 0x1d3   : > { %p696_p13 = pnand %p695_p12, %p691_p9 }
 0x1d5   : > { %699 = shalt.err (!%p696_p13)
}
 0x1d6   : > { %614 = dma.vmem_to_hbm [thread:$0]  (%p821_p4), %s469_s22, 128, %s466_s30, %s455_s26  }
 0x1d7 PF: > { %p620_p0 = scmp.ge.s32.totalorder %s750_s20, 2  ;;  %s480_s14 = sand.u32 1, %s730_s15  }
 0x1d8   : > { %s481_s21 = scalar_lea.sflag [#allocation4], %s480_s14 }
 0x1d9   : > { %p617_p1 = pnand %p620_p0, %p828_p8 }
 0x1db   : > { %p618_p2 = pneg %p617_p1 }
 0x1dd   : > { %725 = dma.done.wait (%p618_p2), %s481_s21, 128  }
 0x1de   : > { %727 = vsyncadd (%p618_p2), %s481_s21, 4294967168  ;;  %s17_s20 = sadd.s32 1, %s750_s20   ;;  %s989_s15 = smov %s734_s16 }
 0x1df   : > { %p14_p3 = scmp.ge.s32.totalorder %s17_s20, 4   ;;  %s990_s16 = smov %s738_s17 }
 0x1e0   : > { %s991_s17 = smov %s834_s28  ;;  %s992_s18 = smov %s746_s19 }
 0x1e1   : > { %s993_s19 = smov %s995_s23  ;;  %16 = sbr.rel (!%p14_p3) target bundleno = 4 (0x4), region = 82 }
 0x1e6   :  { %486 = vsyncpa [#allocation4], 1 }
 0x1e7   :  { %488 = vsyncpa [#allocation4 + $0x1], 1 }

</bundles_post_ra>
